<compile_context>
chip_gen: v7x
topology: tpu7x:2x2x1
jax: 0.10.0
libtpu: 0.0.40
codegen_flags: <defaults>
</compile_context>

<pallas_src>
import functools

import jax
import jax.numpy as jnp
from jax import lax
from jax.experimental import pallas as pl
from jax.experimental.pallas import tpu as pltpu


def _round_up(x, m):
    return (x + m - 1) // m * m


def relu_conv_bn_kernel(x_ref, w_ref, shift_ref, o_ref):
    # ReLU (layer.op[0]).  ReLU commutes with the bf16 cast and with the zero
    # spatial padding, so applying it here is exact.
    x = jnp.maximum(x_ref[...], jnp.zeros((), x_ref.dtype))
    # Conv2d (SubConv, layer.op[1]) as an MXU matmul; the eval-mode BN scale
    # is pre-folded into the weight in the wrapper.
    y = jnp.dot(x, w_ref[...], preferred_element_type=jnp.float32)
    # Fused conv-bias + BatchNorm2d shift (layer.op[2]).
    o_ref[...] = y + shift_ref[...]


def _choose_tm(m, k, cout_pad, vmem_budget_bytes=24 << 20):
    """Largest row tile that keeps pipelined buffers inside a VMEM budget.

    Budget is conservative for v7x (64 MiB physical / 32 MiB default scoped
    VMEM); v5e/v6e have 2x the headroom, so the same tile is safe there too.
    """
    # Per-row bytes: double-buffered bf16 input + double-buffered f32 output.
    per_row = 2 * k * 2 + 2 * cout_pad * 4
    tm = vmem_budget_bytes // max(per_row, 1)
    tm = max(128, min(2048, (tm // 128) * 128))
    return min(tm, _round_up(m, 128))


def relu_conv_bn_subsample(x_nchw, conv_weight, conv_bias, bn_gamma, bn_beta,
                           bn_mean, bn_var, *, kernel_size, stride=1, eps=1e-5):
    N, Cin, H, W = x_nchw.shape
    Cout = conv_weight.shape[0]
    ks = int(kernel_size)
    pad = (ks - 1) // 2

    # SubConv: slice the parent conv weight.
    w_sub = conv_weight[:, :, 1:ks + 1, 1:ks + 1]            # (Cout, Cin, ks, ks)

    Hp, Wp = H + 2 * pad, W + 2 * pad
    Ho = (Hp - ks) // stride + 1
    Wo = (Wp - ks) // stride + 1

    x = jnp.transpose(x_nchw, (0, 2, 3, 1))                  # NHWC

    if ks == 1:
        # 1x1 conv (pad == 0): no im2col — just the strided spatial grid.
        xm = x[:, 0:stride * Ho:stride, 0:stride * Wo:stride, :]
        xm = xm.reshape(N * Ho * Wo, Cin)
    else:
        # TODO(synk): ks > 1 still materializes the ks^2 im2col blow-up in HBM;
        # a shifted-matmul accumulation over (kh, kw) inside the kernel would
        # remove that extra input traffic.
        xp = jnp.pad(x, ((0, 0), (pad, pad), (pad, pad), (0, 0)))
        patches = []
        for dh in range(ks):
            for dw in range(ks):
                patches.append(
                    xp[:, dh:dh + stride * Ho:stride,
                       dw:dw + stride * Wo:stride, :])
        xm = jnp.concatenate(patches, axis=-1).reshape(
            N * Ho * Wo, ks * ks * Cin)

    K = ks * ks * Cin
    M = N * Ho * Wo

    # (Cout, Cin, kh, kw) -> (kh*kw*Cin, Cout), matching (kh, kw, Cin) patches.
    wm = jnp.transpose(w_sub, (2, 3, 1, 0)).reshape(K, Cout).astype(jnp.float32)

    # Fold eval-mode BN + conv bias: scale goes into the weight, shift is a
    # single per-channel add in the kernel epilogue.
    inv_std = 1.0 / jnp.sqrt(bn_var.astype(jnp.float32) + eps)
    scale = bn_gamma.astype(jnp.float32) * inv_std                         # (Cout,)
    shift = ((conv_bias.astype(jnp.float32) - bn_mean.astype(jnp.float32))
             * scale + bn_beta.astype(jnp.float32))                        # (Cout,)
    wm = wm * scale[None, :]

    # Lane-dense output: pad Cout up to a multiple of 128 so the output tile's
    # last dim is unmasked-store friendly; padded columns are zero and sliced
    # off after the call.
    Cp = _round_up(Cout, 128)
    if Cp != Cout:
        wm = jnp.pad(wm, ((0, 0), (0, Cp - Cout)))
        shift = jnp.pad(shift, (0, Cp - Cout))
    shift = shift.reshape(1, Cp).astype(jnp.float32)

    # bf16 input/weight streams (mem-bound), f32 accumulation on the MXU.
    xm = xm.astype(jnp.bfloat16)
    wm = wm.astype(jnp.bfloat16)

    # Row tiling: as large as the VMEM budget allows (single block for the
    # toy shapes in __main__).
    TM = _choose_tm(M, K, Cp)
    Mp = _round_up(M, TM)
    if Mp != M:
        xm = jnp.pad(xm, ((0, Mp - M), (0, 0)))

    out = pl.pallas_call(
        relu_conv_bn_kernel,
        out_shape=jax.ShapeDtypeStruct((Mp, Cp), jnp.float32),
        grid_spec=pltpu.PrefetchScalarGridSpec(
            num_scalar_prefetch=0,
            grid=(Mp // TM,),
            in_specs=[
                pl.BlockSpec((TM, K), lambda i: (i, 0)),   # im2col rows (bf16)
                pl.BlockSpec((K, Cp), lambda i: (0, 0)),   # BN-folded weight (resident)
                pl.BlockSpec((1, Cp), lambda i: (0, 0)),   # conv-bias + BN shift
            ],
            out_specs=pl.BlockSpec((TM, Cp), lambda i: (i, 0)),
        ),
        compiler_params=pltpu.CompilerParams(
            dimension_semantics=("parallel",)),
    )(xm, wm, shift)

    out = out[:M, :Cout].reshape(N, Ho, Wo, Cout)
    return jnp.transpose(out, (0, 3, 1, 2))  # back to NCHW


def _reference(x, w, b, g, beta, mean, var, ks, stride, eps=1e-5):
    xr = jnp.maximum(x, 0.0)
    ws = w[:, :, 1:ks + 1, 1:ks + 1]
    pad = (ks - 1) // 2
    y = lax.conv_general_dilated(
        xr, ws, (stride, stride), [(pad, pad), (pad, pad)],
        dimension_numbers=("NCHW", "OIHW", "NCHW"))
    y = y + b.reshape(1, -1, 1, 1)
    y = ((y - mean.reshape(1, -1, 1, 1)) / jnp.sqrt(var.reshape(1, -1, 1, 1) + eps)
         * g.reshape(1, -1, 1, 1) + beta.reshape(1, -1, 1, 1))
    return y


if __name__ == "__main__":
    key = jax.random.PRNGKey(0)
    k_x, k_w, k_b, k_g, k_be, k_m, k_v = jax.random.split(key, 7)

    N, Cin, H, W = 2, 4, 16, 16
    Cout = 8
    parent_ks = 3          # parent ReLUConvBN conv is 3x3, padding 1
    sub_ks = 1             # sub-sampled kernel size (SubConv slices 3x3 -> 1x1)
    stride = 1

    x = jax.random.normal(k_x, (N, Cin, H, W), dtype=jnp.float32)
    conv_weight = 0.1 * jax.random.normal(
        k_w, (Cout, Cin, parent_ks, parent_ks), dtype=jnp.float32)
    conv_bias = 0.05 * jax.random.normal(k_b, (Cout,), dtype=jnp.float32)
    bn_gamma = 1.0 + 0.1 * jax.random.normal(k_g, (Cout,), dtype=jnp.float32)
    bn_beta = 0.1 * jax.random.normal(k_be, (Cout,), dtype=jnp.float32)
    bn_mean = 0.1 * jax.random.normal(k_m, (Cout,), dtype=jnp.float32)
    bn_var = jnp.abs(jax.random.normal(k_v, (Cout,), dtype=jnp.float32)) + 0.5

    run = jax.jit(functools.partial(
        relu_conv_bn_subsample, kernel_size=sub_ks, stride=stride))
    out = run(x, conv_weight, conv_bias, bn_gamma, bn_beta, bn_mean, bn_var)
    out = jax.block_until_ready(out)

    ref = _reference(x, conv_weight, conv_bias, bn_gamma, bn_beta,
                     bn_mean, bn_var, sub_ks, stride)
    assert out.shape == ref.shape, (out.shape, ref.shape)
    # bf16 input/weight streams with f32 accumulation: loosened tolerance.
    err = float(jnp.max(jnp.abs(out - ref)))
    assert err < 5e-2, err

    print("KERNEL_OK")
</pallas_src>

<mosaic_0001>
module attributes {stable_mosaic.version = 11 : i64} {
  func.func @relu_conv_bn_kernel(%arg0: i32, %arg1: memref<512x4xbf16, #tpu.memory_space<vmem>>, %arg2: memref<4x128xbf16, #tpu.memory_space<vmem>>, %arg3: memref<1x128xf32, #tpu.memory_space<vmem>>, %arg4: memref<512x128xf32, #tpu.memory_space<vmem>>) attributes {dimension_semantics = [#tpu.dimension_semantics<parallel>], iteration_bounds = array<i64: 1>, scalar_prefetch = 0 : i64, scratch_operands = 0 : i64, tpu.core_type = #tpu.core_type<tc>, window_params = [{transform_indices = @transform_0, window_bounds = array<i64: 512, 4>}, {pipeline_mode = #tpu.pipeline_mode<synchronous>, transform_indices = @transform_1, window_bounds = array<i64: 4, 128>}, {pipeline_mode = #tpu.pipeline_mode<synchronous>, transform_indices = @transform_2, window_bounds = array<i64: 1, 128>}, {transform_indices = @transform_3, window_bounds = array<i64: 512, 128>}]} {
    %c0 = arith.constant 0 : index
    %c0_0 = arith.constant 0 : index
    %0 = vector.load %arg1[%c0, %c0_0] : memref<512x4xbf16, #tpu.memory_space<vmem>>, vector<512x4xbf16>
    %cst = arith.constant 0.000000e+00 : bf16
    %1 = vector.broadcast %cst : bf16 to vector<512x4xbf16>
    %2 = arith.maximumf %0, %1 : vector<512x4xbf16>
    %c0_1 = arith.constant 0 : index
    %c0_2 = arith.constant 0 : index
    %3 = vector.load %arg2[%c0_1, %c0_2] : memref<4x128xbf16, #tpu.memory_space<vmem>>, vector<4x128xbf16>
    %cst_3 = arith.constant dense<0.000000e+00> : vector<512x128xf32>
    %4 = tpu.matmul %2, %3, %cst_3 {dimension_numbers = #tpu.dot_dimension_numbers<[1], [0], [0], [1], [0, 0, 1, 1], [], []>} : vector<512x4xbf16>, vector<4x128xbf16>, vector<512x128xf32> -> vector<512x128xf32>
    %c0_4 = arith.constant 0 : index
    %c0_5 = arith.constant 0 : index
    %5 = vector.load %arg3[%c0_4, %c0_5] : memref<1x128xf32, #tpu.memory_space<vmem>>, vector<1x128xf32>
    %6 = vector.broadcast %5 : vector<1x128xf32> to vector<512x128xf32>
    %7 = arith.addf %4, %6 : vector<512x128xf32>
    %c0_6 = arith.constant 0 : index
    %c0_7 = arith.constant 0 : index
    %8 = vector.load %arg4[%c0_6, %c0_7] : memref<512x128xf32, #tpu.memory_space<vmem>>, vector<512x128xf32>
    tpu.vector_store %arg4[%c0_6, %c0_7], %7 {strides = array<i32>} : memref<512x128xf32, #tpu.memory_space<vmem>>, vector<512x128xf32>,
    return
  }
  func.func @transform_0(%arg0: i32) -> (i32, i32) {
    %c0_i32 = arith.constant 0 : i32
    %c0_i32_0 = arith.constant 0 : i32
    return %arg0, %c0_i32 : i32, i32
  }
  func.func @transform_1(%arg0: i32) -> (i32, i32) {
    %c0_i32 = arith.constant 0 : i32
    %c0_i32_0 = arith.constant 0 : i32
    %c0_i32_1 = arith.constant 0 : i32
    return %c0_i32, %c0_i32_0 : i32, i32
  }
  func.func @transform_2(%arg0: i32) -> (i32, i32) {
    %c0_i32 = arith.constant 0 : i32
    %c0_i32_0 = arith.constant 0 : i32
    %c0_i32_1 = arith.constant 0 : i32
    return %c0_i32, %c0_i32_0 : i32, i32
  }
  func.func @transform_3(%arg0: i32) -> (i32, i32) {
    %c0_i32 = arith.constant 0 : i32
    %c0_i32_0 = arith.constant 0 : i32
    return %arg0, %c0_i32 : i32, i32
  }
}

</mosaic_0001>

<bundles_post_ra>
// kernel: relu_conv_bn_subsample.1
= control target key start
LH: loop header
LB: loop body
LE: loop exit
PB: predicated region body
PF: predicated region fallthrough
CT: control target
= control target key end

     0   :  { %vm408_vm0 = vcmask 1041408   ;;  %v938_v4 = vmov 0   ;;  %vm311_vm1 = vcmask 31744   ;;  %s1511_s1 = inlined_call_operand.vmem [shape: bf16[4,128], index: 1, kind: input, shape index: {}]   ;;  %s1512_s0 = inlined_call_operand.vmem [shape: bf16[512,4], index: 0, kind: input, shape index: {}]   ;;  %s1513_s2 = inlined_call_operand.vmem [shape: f32[1,128], index: 2, kind: input, shape index: {}]   ;;  %s1514_s3 = inlined_call_operand.vmem [shape: f32[512,128], index: 3, kind: output, shape index: {}]  }
   0x1   :  { %v143_v0 = vld [vmem:[%s1511_s1] sm:$0x3]  ;;  %v16_v2 = vld [vmem:[%s1512_s0 + $0x4] sm:$0xf]  ;;  %v17_v11 = vld [vmem:[%s1512_s0 + $0x8] sm:$0xf] }
   0x2   :  { %v15_v1 = vld [vmem:[%s1512_s0] sm:$0xf]  ;;  %935 = vmatprep.subr.msk.bf16.mxu0 %vm408_vm0, %v143_v0  ;;  %936 = vmatprep.subr.msk.bf16.mxu1 %vm408_vm0, %v143_v0  ;;  %v410_v3 = vsel %vm408_vm0, %v143_v0, 0  ;;  %v80_v6 = vmax.bf16 %v938_v4, %v16_v2  ;;  %v48_v8 = vld [vmem:[%s1512_s0 + $0x84] sm:$0xf]  ;;  %v81_v15 = vmax.bf16 %v938_v4, %v17_v11 }
   0x3   :  { %v79_v5 = vmax.bf16 %v938_v4, %v15_v1  ;;  %v47_v7 = vld [vmem:[%s1512_s0 + $0x80] sm:$0xf]  ;;  %868 = vmatpush3.bf16.msra.mxu0 %v410_v3  ;;  %934 = vmatpush3.bf16.msra.mxu1 %v410_v3  ;;  %v112_v10 = vmax.bf16 %v938_v4, %v48_v8  ;;  %v18_v12 = vld [vmem:[%s1512_s0 + $0xc] sm:$0xf]  ;;  %v49_v13 = vld [vmem:[%s1512_s0 + $0x88] sm:$0xf] }
   0x4   :  { %v111_v9 = vmax.bf16 %v938_v4, %v47_v7  ;;  %v82_v16 = vmax.bf16 %v938_v4, %v18_v12  ;;  %v50_v17 = vld [vmem:[%s1512_s0 + $0x8c] sm:$0xf]  ;;  %v113_v18 = vmax.bf16 %v938_v4, %v49_v13  ;;  %v19_v19 = vld [vmem:[%s1512_s0 + $0x10] sm:$0xf]  ;;  %v20_v20 = vld [vmem:[%s1512_s0 + $0x14] sm:$0xf] }
   0x5   :  { %v770_v14 = vcombine.low %v79_v5, %v80_v6  ;;  %v114_v22 = vmax.bf16 %v938_v4, %v50_v17  ;;  %v83_v23 = vmax.bf16 %v938_v4, %v19_v19  ;;  %v84_v24 = vmax.bf16 %v938_v4, %v20_v20  ;;  %v51_v25 = vld [vmem:[%s1512_s0 + $0x90] sm:$0xf]  ;;  %v52_v26 = vld [vmem:[%s1512_s0 + $0x94] sm:$0xf]  ;;  %v21_v27 = vld [vmem:[%s1512_s0 + $0x18] sm:$0xf] }
   0x6   :  { %v786_v21 = vcombine.low %v111_v9, %v112_v10  ;;  %v771_v28 = vcombine.low %v81_v15, %v82_v16  ;;  %v115_v29 = vmax.bf16 %v938_v4, %v51_v25  ;;  %v116_v30 = vmax.bf16 %v938_v4, %v52_v26  ;;  %v22_v31 = vld [vmem:[%s1512_s0 + $0x1c] sm:$0xf]  ;;  %v53_v32 = vld [vmem:[%s1512_s0 + $0x98] sm:$0xf]  ;;  %v23_v36 = vld [vmem:[%s1512_s0 + $0x20] sm:$0xf] }
   0x7   :  { %869 = vmatprep.mubr.msk.bf16.mxu0 %vm311_vm1, %v770_v14  ;;  %v54_v33 = vld [vmem:[%s1512_s0 + $0x9c] sm:$0xf]  ;;  %v787_v34 = vcombine.low %v113_v18, %v114_v22  ;;  %v772_v35 = vcombine.low %v83_v23, %v84_v24  ;;  %v24_v37 = vld [vmem:[%s1512_s0 + $0x24] sm:$0xf]  ;;  %v55_v38 = vld [vmem:[%s1512_s0 + $0xa0] sm:$0xf]  ;;  %v85_v40 = vmax.bf16 %v938_v4, %v21_v27  ;;  %v86_v41 = vmax.bf16 %v938_v4, %v22_v31 }
   0x8   :  { %901 = vmatprep.mubr.msk.bf16.mxu1 %vm311_vm1, %v786_v21  ;;  %870 = vmatmul.mubr.msk.bf16.vlgmr.msra.gmra.mrb[0].mxu0 %vm311_vm1, %v771_v28  ;;  %v788_v39 = vcombine.low %v115_v29, %v116_v30  ;;  %v117_v42 = vmax.bf16 %v938_v4, %v53_v32  ;;  %v56_v43 = vld [vmem:[%s1512_s0 + $0xa4] sm:$0xf]  ;;  %v118_v44 = vmax.bf16 %v938_v4, %v54_v33  ;;  %v25_v52 = vld [vmem:[%s1512_s0 + $0x28] sm:$0xf]  ;;  %v26_v53 = vld [vmem:[%s1512_s0 + $0x2c] sm:$0xf] }
   0x9   :  { %902 = vmatmul.mubr.msk.bf16.vlgmr.msra.gmra.mrb[0].mxu1 %vm311_vm1, %v787_v34  ;;  %873 = vmatprep.mubr.msk.bf16.mxu0 %vm311_vm1, %v772_v35  ;;  %v87_v45 = vmax.bf16 %v938_v4, %v23_v36  ;;  %v88_v46 = vmax.bf16 %v938_v4, %v24_v37  ;;  %v119_v47 = vmax.bf16 %v938_v4, %v55_v38  ;;  %v57_v54 = vld [vmem:[%s1512_s0 + $0xa8] sm:$0xf]  ;;  %v58_v56 = vld [vmem:[%s1512_s0 + $0xac] sm:$0xf]  ;;  %v27_v57 = vld [vmem:[%s1512_s0 + $0x30] sm:$0xf] }
   0xa   :  { %905 = vmatprep.mubr.msk.bf16.mxu1 %vm311_vm1, %v788_v39  ;;  %v120_v48 = vmax.bf16 %v938_v4, %v56_v43  ;;  %v773_v49 = vcombine.low %v85_v40, %v86_v41  ;;  %v789_v50 = vcombine.low %v117_v42, %v118_v44  ;;  %v28_v58 = vld [vmem:[%s1512_s0 + $0x34] sm:$0xf]  ;;  %v59_v59 = vld [vmem:[%s1512_s0 + $0xb0] sm:$0xf]  ;;  %v89_v61 = vmax.bf16 %v938_v4, %v25_v52  ;;  %v29_v9 = vld [vmem:[%s1512_s0 + $0x38] sm:$0xf] }
   0xb   :  { %v774_v51 = vcombine.low %v87_v45, %v88_v46  ;;  %v60_v60 = vld [vmem:[%s1512_s0 + $0xb4] sm:$0xf]  ;;  %v90_v62 = vmax.bf16 %v938_v4, %v26_v53  ;;  %v121_v63 = vmax.bf16 %v938_v4, %v57_v54  ;;  %v122_v0 = vmax.bf16 %v938_v4, %v58_v56  ;;  %v30_v10 = vld [vmem:[%s1512_s0 + $0x3c] sm:$0xf]  ;;  %v61_v11 = vld [vmem:[%s1512_s0 + $0xb8] sm:$0xf] }
   0xc   :  { %v790_v55 = vcombine.low %v119_v47, %v120_v48  ;;  %v91_v1 = vmax.bf16 %v938_v4, %v27_v57  ;;  %v92_v2 = vmax.bf16 %v938_v4, %v28_v58  ;;  %v123_v3 = vmax.bf16 %v938_v4, %v59_v59  ;;  %v62_v13 = vld [vmem:[%s1512_s0 + $0xbc] sm:$0xf]  ;;  %v31_v14 = vld [vmem:[%s1512_s0 + $0x40] sm:$0xf]  ;;  %v32_v15 = vld [vmem:[%s1512_s0 + $0x44] sm:$0xf] }
   0xd   :  { %v124_v5 = vmax.bf16 %v938_v4, %v60_v60  ;;  %v775_v6 = vcombine.low %v89_v61, %v90_v62  ;;  %v791_v7 = vcombine.low %v121_v63, %v122_v0  ;;  %v63_v16 = vld [vmem:[%s1512_s0 + $0xc0] sm:$0xf]  ;;  %v64_v17 = vld [vmem:[%s1512_s0 + $0xc4] sm:$0xf]  ;;  %v93_v18 = vmax.bf16 %v938_v4, %v29_v9  ;;  %v33_v29 = vld [vmem:[%s1512_s0 + $0x48] sm:$0xf] }
   0xe   :  { %v776_v8 = vcombine.low %v91_v1, %v92_v2  ;;  %v94_v19 = vmax.bf16 %v938_v4, %v30_v10  ;;  %v125_v20 = vmax.bf16 %v938_v4, %v61_v11  ;;  %v126_v21 = vmax.bf16 %v938_v4, %v62_v13  ;;  %v34_v30 = vld [vmem:[%s1512_s0 + $0x4c] sm:$0xf]  ;;  %v65_v31 = vld [vmem:[%s1512_s0 + $0xc8] sm:$0xf]  ;;  %v35_v34 = vld [vmem:[%s1512_s0 + $0x50] sm:$0xf] }
   0xf   :  { %v792_v12 = vcombine.low %v123_v3, %v124_v5  ;;  %v95_v22 = vmax.bf16 %v938_v4, %v31_v14  ;;  %v96_v23 = vmax.bf16 %v938_v4, %v32_v15  ;;  %v127_v24 = vmax.bf16 %v938_v4, %v63_v16  ;;  %v66_v33 = vld [vmem:[%s1512_s0 + $0xcc] sm:$0xf]  ;;  %v36_v35 = vld [vmem:[%s1512_s0 + $0x54] sm:$0xf]  ;;  %v67_v36 = vld [vmem:[%s1512_s0 + $0xd0] sm:$0xf] }
  0x10   :  { %874 = vmatmul.mubr.msk.bf16.gmra.mrb[4].mxu0 %vm311_vm1, %v773_v49  ;;  %v128_v25 = vmax.bf16 %v938_v4, %v64_v17  ;;  %v777_v26 = vcombine.low %v93_v18, %v94_v19  ;;  %v793_v27 = vcombine.low %v125_v20, %v126_v21  ;;  %v68_v37 = vld [vmem:[%s1512_s0 + $0xd4] sm:$0xf]  ;;  %v97_v38 = vmax.bf16 %v938_v4, %v33_v29  ;;  %v37_v49 = vld [vmem:[%s1512_s0 + $0x58] sm:$0xf]  ;;  %v70_v53 = vld [vmem:[%s1512_s0 + $0xdc] sm:$0xf] }
  0x11   :  { %906 = vmatmul.mubr.msk.bf16.gmra.mrb[4].mxu1 %vm311_vm1, %v789_v50  ;;  %877 = vmatprep.mubr.msk.bf16.mxu0 %vm311_vm1, %v774_v51  ;;  %v778_v28 = vcombine.low %v95_v22, %v96_v23  ;;  %v98_v39 = vmax.bf16 %v938_v4, %v34_v30  ;;  %v129_v40 = vmax.bf16 %v938_v4, %v65_v31  ;;  %v38_v50 = vld [vmem:[%s1512_s0 + $0x5c] sm:$0xf]  ;;  %v69_v51 = vld [vmem:[%s1512_s0 + $0xd8] sm:$0xf]  ;;  %v39_v54 = vld [vmem:[%s1512_s0 + $0x60] sm:$0xf] }
  0x12   :  { %909 = vmatprep.mubr.msk.bf16.mxu1 %vm311_vm1, %v790_v55  ;;  %v794_v32 = vcombine.low %v127_v24, %v128_v25  ;;  %v130_v41 = vmax.bf16 %v938_v4, %v66_v33  ;;  %v99_v42 = vmax.bf16 %v938_v4, %v35_v34  ;;  %v100_v43 = vmax.bf16 %v938_v4, %v36_v35  ;;  %v40_v55 = vld [vmem:[%s1512_s0 + $0x64] sm:$0xf]  ;;  %v71_v56 = vld [vmem:[%s1512_s0 + $0xe0] sm:$0xf]  ;;  %v74_v10 = vld [vmem:[%s1512_s0 + $0xec] sm:$0xf] }
  0x13   :  { %v131_v44 = vmax.bf16 %v938_v4, %v67_v36  ;;  %v132_v45 = vmax.bf16 %v938_v4, %v68_v37  ;;  %v779_v46 = vcombine.low %v97_v38, %v98_v39  ;;  %v72_v57 = vld [vmem:[%s1512_s0 + $0xe4] sm:$0xf]  ;;  %v101_v58 = vmax.bf16 %v938_v4, %v37_v49  ;;  %v43_v11 = vld [vmem:[%s1512_s0 + $0x70] sm:$0xf]  ;;  %v76_v14 = vld [vmem:[%s1512_s0 + $0xf4] sm:$0xf] }
  0x14   :  { %v795_v47 = vcombine.low %v129_v40, %v130_v41  ;;  %v780_v48 = vcombine.low %v99_v42, %v100_v43  ;;  %v102_v59 = vmax.bf16 %v938_v4, %v38_v50  ;;  %v133_v60 = vmax.bf16 %v938_v4, %v69_v51  ;;  %v75_v13 = vld [vmem:[%s1512_s0 + $0xf0] sm:$0xf]  ;;  %v77_v29 = vld [vmem:[%s1512_s0 + $0xf8] sm:$0xf]  ;;  %v78_v30 = vld [vmem:[%s1512_s0 + $0xfc] sm:$0xf] }
  0x15   :  { %v796_v52 = vcombine.low %v131_v44, %v132_v45  ;;  %v134_v61 = vmax.bf16 %v938_v4, %v70_v53  ;;  %v103_v62 = vmax.bf16 %v938_v4, %v39_v54  ;;  %v104_v63 = vmax.bf16 %v938_v4, %v40_v55  ;;  %v1253_v37 = vld [vmem:[%s1513_s2] ss:$0 sm:$0xff] }
  0x16   :  { %v135_v0 = vmax.bf16 %v938_v4, %v71_v56  ;;  %v136_v1 = vmax.bf16 %v938_v4, %v72_v57  ;;  %v781_v2 = vcombine.low %v101_v58, %v102_v59  ;;  %v138_v18 = vmax.bf16 %v938_v4, %v74_v10 }
  0x17   :  { %v797_v3 = vcombine.low %v133_v60, %v134_v61  ;;  %v782_v5 = vcombine.low %v103_v62, %v104_v63  ;;  %v107_v19 = vmax.bf16 %v938_v4, %v43_v11  ;;  %v139_v21 = vmax.bf16 %v938_v4, %v75_v13 }
  0x18   :  { %878 = vmatmul.mubr.msk.bf16.gmra.mrb[8].mxu0 %vm311_vm1, %v775_v6  ;;  %v41_v6 = vld [vmem:[%s1512_s0 + $0x68] sm:$0xf]  ;;  %v798_v9 = vcombine.low %v135_v0, %v136_v1  ;;  %v140_v22 = vmax.bf16 %v938_v4, %v76_v14  ;;  %v141_v33 = vmax.bf16 %v938_v4, %v77_v29  ;;  %v142_v34 = vmax.bf16 %v938_v4, %v78_v30 }
  0x19   :  { %910 = vmatmul.mubr.msk.bf16.gmra.mrb[8].mxu1 %vm311_vm1, %v791_v7  ;;  %881 = vmatprep.mubr.msk.bf16.mxu0 %vm311_vm1, %v776_v8  ;;  %v42_v7 = vld [vmem:[%s1512_s0 + $0x6c] sm:$0xf]  ;;  %v73_v8 = vld [vmem:[%s1512_s0 + $0xe8] sm:$0xf]  ;;  %v105_v15 = vmax.bf16 %v938_v4, %v41_v6 }
  0x1a   :  { %913 = vmatprep.mubr.msk.bf16.mxu1 %vm311_vm1, %v792_v12  ;;  %v44_v12 = vld [vmem:[%s1512_s0 + $0x74] sm:$0xf]  ;;  %v106_v16 = vmax.bf16 %v938_v4, %v42_v7  ;;  %v137_v17 = vmax.bf16 %v938_v4, %v73_v8  ;;  %v801_v36 = vcombine.low %v141_v33, %v142_v34 }
  0x1b   :  { %v108_v20 = vmax.bf16 %v938_v4, %v44_v12 }
  0x1c   :  { %v783_v23 = vcombine.low %v105_v15, %v106_v16  ;;  %v799_v24 = vcombine.low %v137_v17, %v138_v18 }
  0x1d   :  { %v784_v25 = vcombine.low %v107_v19, %v108_v20 }
  0x20   :  { %882 = vmatmul.mubr.msk.bf16.gmra.mrb[12].mxu0 %vm311_vm1, %v777_v26  ;;  %v45_v26 = vld [vmem:[%s1512_s0 + $0x78] sm:$0xf] }
  0x21   :  { %914 = vmatmul.mubr.msk.bf16.gmra.mrb[12].mxu1 %vm311_vm1, %v793_v27  ;;  %885 = vmatprep.mubr.msk.bf16.mxu0 %vm311_vm1, %v778_v28  ;;  %v46_v27 = vld [vmem:[%s1512_s0 + $0x7c] sm:$0xf]  ;;  %v800_v28 = vcombine.low %v139_v21, %v140_v22  ;;  %v109_v31 = vmax.bf16 %v938_v4, %v45_v26 }
  0x22   :  { %917 = vmatprep.mubr.msk.bf16.mxu1 %vm311_vm1, %v794_v32  ;;  %v110_v32 = vmax.bf16 %v938_v4, %v46_v27 }
  0x24   :  { %v785_v35 = vcombine.low %v109_v31, %v110_v32 }
  0x28   :  { %886 = vmatmul.mubr.msk.bf16.gmra.mrb[16].mxu0 %vm311_vm1, %v779_v46 }
  0x29   :  { %918 = vmatmul.mubr.msk.bf16.gmra.mrb[16].mxu1 %vm311_vm1, %v795_v47  ;;  %889 = vmatprep.mubr.msk.bf16.mxu0 %vm311_vm1, %v780_v48 }
  0x2a   :  { %921 = vmatprep.mubr.msk.bf16.mxu1 %vm311_vm1, %v796_v52 }
  0x30   :  { %890 = vmatmul.mubr.msk.bf16.gmra.mrb[20].mxu0 %vm311_vm1, %v781_v2 }
  0x31   :  { %922 = vmatmul.mubr.msk.bf16.gmra.mrb[20].mxu1 %vm311_vm1, %v797_v3  ;;  %893 = vmatprep.mubr.msk.bf16.mxu0 %vm311_vm1, %v782_v5 }
  0x32   :  { %925 = vmatprep.mubr.msk.bf16.mxu1 %vm311_vm1, %v798_v9 }
  0x38   :  { %894 = vmatmul.mubr.msk.bf16.gmra.mrb[24].mxu0 %vm311_vm1, %v783_v23 }
  0x39   :  { %926 = vmatmul.mubr.msk.bf16.gmra.mrb[24].mxu1 %vm311_vm1, %v799_v24  ;;  %897 = vmatprep.mubr.msk.bf16.mxu0 %vm311_vm1, %v784_v25 }
  0x3a   :  { %929 = vmatprep.mubr.msk.bf16.mxu1 %vm311_vm1, %v800_v28 }
  0x40   :  { %898 = vmatmul.mubr.msk.bf16.gmra.mrb[28].mxu0 %vm311_vm1, %v785_v35 }
  0x41   :  { %930 = vmatmul.mubr.msk.bf16.gmra.mrb[28].mxu1 %vm311_vm1, %v801_v36 }
  0xdb   :  { %v871_v38 = vpop.f32.mrb[0].mxu0 }
  0xdc   :  { %v455_v39 = vadd.f32 %v871_v38, %v1253_v37  ;;  %v903_v40 = vpop.f32.mrb[0].mxu1  ;;  %v446_v41 = vpop.f32.mrb[1].mxu0 }
  0xdd   :  { %v583_v4 = vadd.f32 %v903_v40, %v1253_v37  ;;  %v447_v42 = vadd.f32 %v1253_v37, %v446_v41  ;;  %v574_v43 = vpop.f32.mrb[1].mxu1  ;;  %v872_v44 = vpop.f32.mrb[2].mxu0 }
  0xde   :  { %703 = vst [vmem:[%s1514_s3 + $0x10] sm:$0xff] %v455_v39  ;;  %v575_v45 = vadd.f32 %v1253_v37, %v574_v43  ;;  %v458_v46 = vadd.f32 %v872_v44, %v1253_v37  ;;  %v904_v47 = vpop.f32.mrb[2].mxu1  ;;  %v449_v48 = vpop.f32.mrb[3].mxu0 }
  0xdf   :  { %735 = vst [vmem:[%s1514_s3 + $0x110] sm:$0xff] %v583_v4  ;;  %701 = vst [vmem:[%s1514_s3] sm:$0xff] %v447_v42  ;;  %v586_v49 = vadd.f32 %v904_v47, %v1253_v37  ;;  %v450_v50 = vadd.f32 %v1253_v37, %v449_v48  ;;  %v577_v51 = vpop.f32.mrb[3].mxu1 }
  0xe0   :  { %733 = vst [vmem:[%s1514_s3 + $0x100] sm:$0xff] %v575_v45  ;;  %704 = vst [vmem:[%s1514_s3 + $0x18] sm:$0xff] %v458_v46  ;;  %v578_v52 = vadd.f32 %v1253_v37, %v577_v51 }
  0xe1   :  { %736 = vst [vmem:[%s1514_s3 + $0x118] sm:$0xff] %v586_v49  ;;  %702 = vst [vmem:[%s1514_s3 + $0x8] sm:$0xff] %v450_v50 }
  0xe2   :  { %734 = vst [vmem:[%s1514_s3 + $0x108] sm:$0xff] %v578_v52 }
  0xe3   :  { %v875_v53 = vpop.f32.mrb[4].mxu0 }
  0xe4   :  { %v471_v54 = vadd.f32 %v875_v53, %v1253_v37  ;;  %v907_v55 = vpop.f32.mrb[4].mxu1  ;;  %v462_v56 = vpop.f32.mrb[5].mxu0 }
  0xe5   :  { %v599_v57 = vadd.f32 %v907_v55, %v1253_v37  ;;  %v463_v58 = vadd.f32 %v1253_v37, %v462_v56  ;;  %v590_v59 = vpop.f32.mrb[5].mxu1  ;;  %v876_v60 = vpop.f32.mrb[6].mxu0 }
  0xe6   :  { %707 = vst [vmem:[%s1514_s3 + $0x30] sm:$0xff] %v471_v54  ;;  %v591_v61 = vadd.f32 %v1253_v37, %v590_v59  ;;  %v474_v62 = vadd.f32 %v876_v60, %v1253_v37  ;;  %v908_v63 = vpop.f32.mrb[6].mxu1  ;;  %v465_v0 = vpop.f32.mrb[7].mxu0 }
  0xe7   :  { %739 = vst [vmem:[%s1514_s3 + $0x130] sm:$0xff] %v599_v57  ;;  %705 = vst [vmem:[%s1514_s3 + $0x20] sm:$0xff] %v463_v58  ;;  %v602_v1 = vadd.f32 %v908_v63, %v1253_v37  ;;  %v466_v2 = vadd.f32 %v1253_v37, %v465_v0  ;;  %v593_v3 = vpop.f32.mrb[7].mxu1 }
  0xe8   :  { %737 = vst [vmem:[%s1514_s3 + $0x120] sm:$0xff] %v591_v61  ;;  %708 = vst [vmem:[%s1514_s3 + $0x38] sm:$0xff] %v474_v62  ;;  %v594_v5 = vadd.f32 %v1253_v37, %v593_v3 }
  0xe9   :  { %740 = vst [vmem:[%s1514_s3 + $0x138] sm:$0xff] %v602_v1  ;;  %706 = vst [vmem:[%s1514_s3 + $0x28] sm:$0xff] %v466_v2 }
  0xea   :  { %738 = vst [vmem:[%s1514_s3 + $0x128] sm:$0xff] %v594_v5 }
  0xeb   :  { %v879_v6 = vpop.f32.mrb[8].mxu0 }
  0xec   :  { %v487_v7 = vadd.f32 %v879_v6, %v1253_v37  ;;  %v911_v8 = vpop.f32.mrb[8].mxu1  ;;  %v478_v9 = vpop.f32.mrb[9].mxu0 }
  0xed   :  { %v615_v10 = vadd.f32 %v911_v8, %v1253_v37  ;;  %v479_v11 = vadd.f32 %v1253_v37, %v478_v9  ;;  %v606_v12 = vpop.f32.mrb[9].mxu1  ;;  %v880_v13 = vpop.f32.mrb[10].mxu0 }
  0xee   :  { %711 = vst [vmem:[%s1514_s3 + $0x50] sm:$0xff] %v487_v7  ;;  %v607_v14 = vadd.f32 %v1253_v37, %v606_v12  ;;  %v490_v15 = vadd.f32 %v880_v13, %v1253_v37  ;;  %v912_v16 = vpop.f32.mrb[10].mxu1  ;;  %v481_v17 = vpop.f32.mrb[11].mxu0 }
  0xef   :  { %743 = vst [vmem:[%s1514_s3 + $0x150] sm:$0xff] %v615_v10  ;;  %709 = vst [vmem:[%s1514_s3 + $0x40] sm:$0xff] %v479_v11  ;;  %v618_v18 = vadd.f32 %v912_v16, %v1253_v37  ;;  %v482_v19 = vadd.f32 %v1253_v37, %v481_v17  ;;  %v609_v20 = vpop.f32.mrb[11].mxu1 }
  0xf0   :  { %741 = vst [vmem:[%s1514_s3 + $0x140] sm:$0xff] %v607_v14  ;;  %712 = vst [vmem:[%s1514_s3 + $0x58] sm:$0xff] %v490_v15  ;;  %v610_v21 = vadd.f32 %v1253_v37, %v609_v20 }
  0xf1   :  { %744 = vst [vmem:[%s1514_s3 + $0x158] sm:$0xff] %v618_v18  ;;  %710 = vst [vmem:[%s1514_s3 + $0x48] sm:$0xff] %v482_v19 }
  0xf2   :  { %742 = vst [vmem:[%s1514_s3 + $0x148] sm:$0xff] %v610_v21 }
  0xf3   :  { %v883_v22 = vpop.f32.mrb[12].mxu0 }
  0xf4   :  { %v503_v23 = vadd.f32 %v883_v22, %v1253_v37  ;;  %v915_v24 = vpop.f32.mrb[12].mxu1  ;;  %v494_v25 = vpop.f32.mrb[13].mxu0 }
  0xf5   :  { %v631_v26 = vadd.f32 %v915_v24, %v1253_v37  ;;  %v495_v27 = vadd.f32 %v1253_v37, %v494_v25  ;;  %v622_v28 = vpop.f32.mrb[13].mxu1  ;;  %v884_v29 = vpop.f32.mrb[14].mxu0 }
  0xf6   :  { %715 = vst [vmem:[%s1514_s3 + $0x70] sm:$0xff] %v503_v23  ;;  %v623_v30 = vadd.f32 %v1253_v37, %v622_v28  ;;  %v506_v31 = vadd.f32 %v884_v29, %v1253_v37  ;;  %v916_v32 = vpop.f32.mrb[14].mxu1  ;;  %v497_v33 = vpop.f32.mrb[15].mxu0 }
  0xf7   :  { %747 = vst [vmem:[%s1514_s3 + $0x170] sm:$0xff] %v631_v26  ;;  %713 = vst [vmem:[%s1514_s3 + $0x60] sm:$0xff] %v495_v27  ;;  %v634_v34 = vadd.f32 %v916_v32, %v1253_v37  ;;  %v498_v35 = vadd.f32 %v1253_v37, %v497_v33  ;;  %v625_v36 = vpop.f32.mrb[15].mxu1 }
  0xf8   :  { %745 = vst [vmem:[%s1514_s3 + $0x160] sm:$0xff] %v623_v30  ;;  %716 = vst [vmem:[%s1514_s3 + $0x78] sm:$0xff] %v506_v31  ;;  %v626_v38 = vadd.f32 %v1253_v37, %v625_v36 }
  0xf9   :  { %748 = vst [vmem:[%s1514_s3 + $0x178] sm:$0xff] %v634_v34  ;;  %714 = vst [vmem:[%s1514_s3 + $0x68] sm:$0xff] %v498_v35 }
  0xfa   :  { %746 = vst [vmem:[%s1514_s3 + $0x168] sm:$0xff] %v626_v38 }
  0xfb   :  { %v887_v39 = vpop.f32.mrb[16].mxu0 }
  0xfc   :  { %v519_v40 = vadd.f32 %v887_v39, %v1253_v37  ;;  %v919_v41 = vpop.f32.mrb[16].mxu1  ;;  %v510_v4 = vpop.f32.mrb[17].mxu0 }
  0xfd   :  { %v647_v42 = vadd.f32 %v919_v41, %v1253_v37  ;;  %v511_v43 = vadd.f32 %v1253_v37, %v510_v4  ;;  %v638_v44 = vpop.f32.mrb[17].mxu1  ;;  %v888_v45 = vpop.f32.mrb[18].mxu0 }
  0xfe   :  { %719 = vst [vmem:[%s1514_s3 + $0x90] sm:$0xff] %v519_v40  ;;  %v639_v46 = vadd.f32 %v1253_v37, %v638_v44  ;;  %v522_v47 = vadd.f32 %v888_v45, %v1253_v37  ;;  %v920_v48 = vpop.f32.mrb[18].mxu1  ;;  %v513_v49 = vpop.f32.mrb[19].mxu0 }
  0xff   :  { %751 = vst [vmem:[%s1514_s3 + $0x190] sm:$0xff] %v647_v42  ;;  %717 = vst [vmem:[%s1514_s3 + $0x80] sm:$0xff] %v511_v43  ;;  %v650_v50 = vadd.f32 %v920_v48, %v1253_v37  ;;  %v514_v51 = vadd.f32 %v1253_v37, %v513_v49  ;;  %v641_v52 = vpop.f32.mrb[19].mxu1 }
 0x100   :  { %749 = vst [vmem:[%s1514_s3 + $0x180] sm:$0xff] %v639_v46  ;;  %720 = vst [vmem:[%s1514_s3 + $0x98] sm:$0xff] %v522_v47  ;;  %v642_v53 = vadd.f32 %v1253_v37, %v641_v52 }
 0x101   :  { %752 = vst [vmem:[%s1514_s3 + $0x198] sm:$0xff] %v650_v50  ;;  %718 = vst [vmem:[%s1514_s3 + $0x88] sm:$0xff] %v514_v51 }
 0x102   :  { %750 = vst [vmem:[%s1514_s3 + $0x188] sm:$0xff] %v642_v53 }
 0x103   :  { %v891_v54 = vpop.f32.mrb[20].mxu0 }
 0x104   :  { %v535_v55 = vadd.f32 %v891_v54, %v1253_v37  ;;  %v923_v56 = vpop.f32.mrb[20].mxu1  ;;  %v526_v57 = vpop.f32.mrb[21].mxu0 }
 0x105   :  { %v663_v58 = vadd.f32 %v923_v56, %v1253_v37  ;;  %v527_v59 = vadd.f32 %v1253_v37, %v526_v57  ;;  %v654_v60 = vpop.f32.mrb[21].mxu1  ;;  %v892_v61 = vpop.f32.mrb[22].mxu0 }
 0x106   :  { %723 = vst [vmem:[%s1514_s3 + $0xb0] sm:$0xff] %v535_v55  ;;  %v655_v62 = vadd.f32 %v1253_v37, %v654_v60  ;;  %v538_v63 = vadd.f32 %v892_v61, %v1253_v37  ;;  %v924_v0 = vpop.f32.mrb[22].mxu1  ;;  %v529_v1 = vpop.f32.mrb[23].mxu0 }
 0x107   :  { %755 = vst [vmem:[%s1514_s3 + $0x1b0] sm:$0xff] %v663_v58  ;;  %721 = vst [vmem:[%s1514_s3 + $0xa0] sm:$0xff] %v527_v59  ;;  %v666_v2 = vadd.f32 %v924_v0, %v1253_v37  ;;  %v530_v3 = vadd.f32 %v1253_v37, %v529_v1  ;;  %v657_v5 = vpop.f32.mrb[23].mxu1 }
 0x108   :  { %753 = vst [vmem:[%s1514_s3 + $0x1a0] sm:$0xff] %v655_v62  ;;  %724 = vst [vmem:[%s1514_s3 + $0xb8] sm:$0xff] %v538_v63  ;;  %v658_v6 = vadd.f32 %v1253_v37, %v657_v5 }
 0x109   :  { %756 = vst [vmem:[%s1514_s3 + $0x1b8] sm:$0xff] %v666_v2  ;;  %722 = vst [vmem:[%s1514_s3 + $0xa8] sm:$0xff] %v530_v3 }
 0x10a   :  { %754 = vst [vmem:[%s1514_s3 + $0x1a8] sm:$0xff] %v658_v6 }
 0x10b   :  { %v895_v7 = vpop.f32.mrb[24].mxu0 }
 0x10c   :  { %v551_v8 = vadd.f32 %v895_v7, %v1253_v37  ;;  %v927_v9 = vpop.f32.mrb[24].mxu1  ;;  %v542_v10 = vpop.f32.mrb[25].mxu0 }
 0x10d   :  { %v679_v11 = vadd.f32 %v927_v9, %v1253_v37  ;;  %v543_v12 = vadd.f32 %v1253_v37, %v542_v10  ;;  %v670_v13 = vpop.f32.mrb[25].mxu1  ;;  %v896_v14 = vpop.f32.mrb[26].mxu0 }
 0x10e   :  { %727 = vst [vmem:[%s1514_s3 + $0xd0] sm:$0xff] %v551_v8  ;;  %v671_v15 = vadd.f32 %v1253_v37, %v670_v13  ;;  %v554_v16 = vadd.f32 %v896_v14, %v1253_v37  ;;  %v928_v17 = vpop.f32.mrb[26].mxu1  ;;  %v545_v18 = vpop.f32.mrb[27].mxu0 }
 0x10f   :  { %759 = vst [vmem:[%s1514_s3 + $0x1d0] sm:$0xff] %v679_v11  ;;  %725 = vst [vmem:[%s1514_s3 + $0xc0] sm:$0xff] %v543_v12  ;;  %v682_v19 = vadd.f32 %v928_v17, %v1253_v37  ;;  %v546_v20 = vadd.f32 %v1253_v37, %v545_v18  ;;  %v673_v21 = vpop.f32.mrb[27].mxu1 }
 0x110   :  { %757 = vst [vmem:[%s1514_s3 + $0x1c0] sm:$0xff] %v671_v15  ;;  %728 = vst [vmem:[%s1514_s3 + $0xd8] sm:$0xff] %v554_v16  ;;  %v674_v22 = vadd.f32 %v1253_v37, %v673_v21 }
 0x111   :  { %760 = vst [vmem:[%s1514_s3 + $0x1d8] sm:$0xff] %v682_v19  ;;  %726 = vst [vmem:[%s1514_s3 + $0xc8] sm:$0xff] %v546_v20 }
 0x112   :  { %758 = vst [vmem:[%s1514_s3 + $0x1c8] sm:$0xff] %v674_v22 }
 0x113   :  { %v899_v23 = vpop.f32.mrb[28].mxu0 }
 0x114   :  { %v567_v24 = vadd.f32 %v899_v23, %v1253_v37  ;;  %v931_v25 = vpop.f32.mrb[28].mxu1  ;;  %v558_v26 = vpop.f32.mrb[29].mxu0 }
 0x115   :  { %v695_v27 = vadd.f32 %v931_v25, %v1253_v37  ;;  %v559_v28 = vadd.f32 %v1253_v37, %v558_v26  ;;  %v686_v29 = vpop.f32.mrb[29].mxu1  ;;  %v900_v30 = vpop.f32.mrb[30].mxu0 }
 0x116   :  { %731 = vst [vmem:[%s1514_s3 + $0xf0] sm:$0xff] %v567_v24  ;;  %v687_v31 = vadd.f32 %v1253_v37, %v686_v29  ;;  %v570_v32 = vadd.f32 %v900_v30, %v1253_v37  ;;  %v932_v33 = vpop.f32.mrb[30].mxu1  ;;  %v561_v34 = vpop.f32.mrb[31].mxu0 }
 0x117   :  { %763 = vst [vmem:[%s1514_s3 + $0x1f0] sm:$0xff] %v695_v27  ;;  %729 = vst [vmem:[%s1514_s3 + $0xe0] sm:$0xff] %v559_v28  ;;  %v698_v35 = vadd.f32 %v932_v33, %v1253_v37  ;;  %v562_v36 = vadd.f32 %v1253_v37, %v561_v34  ;;  %v689_v38 = vpop.f32.mrb[31].mxu1 }
 0x118   :  { %761 = vst [vmem:[%s1514_s3 + $0x1e0] sm:$0xff] %v687_v31  ;;  %732 = vst [vmem:[%s1514_s3 + $0xf8] sm:$0xff] %v570_v32  ;;  %v690_v39 = vadd.f32 %v1253_v37, %v689_v38 }
 0x119   :  { %764 = vst [vmem:[%s1514_s3 + $0x1f8] sm:$0xff] %v698_v35  ;;  %730 = vst [vmem:[%s1514_s3 + $0xe8] sm:$0xff] %v562_v36 }
 0x11a   :  { %762 = vst [vmem:[%s1514_s3 + $0x1e8] sm:$0xff] %v690_v39 }

</bundles_post_ra>
